<compile_context>
chip_gen: v5e
topology: v5e:2x2
jax: 0.10.0
libtpu: 0.0.40
codegen_flags: <defaults>
</compile_context>

<pallas_src>
import jax
import jax.numpy as jnp
from jax.experimental import pallas as pl
from jax.experimental.pallas import tpu as pltpu

EPS = 1e-5  # PyTorch InstanceNorm1d default eps


# ----------------------------------------------------------------------------
# Kernels
# ----------------------------------------------------------------------------
def _adain_kernel(x_ref, g_ref, b_ref, o_ref):
    """Single-pass path. x_ref/o_ref: (CT, L); g_ref/b_ref: (CT, 1) f32."""
    x = x_ref[...].astype(jnp.float32)                      # (CT, L)
    mean = jnp.mean(x, axis=1, keepdims=True)               # (CT, 1)
    xc = x - mean                                           # centered (no cancellation)
    var = jnp.mean(xc * xc, axis=1, keepdims=True)          # (CT, 1), biased
    scale = (1.0 + g_ref[...]) * jax.lax.rsqrt(var + EPS)   # (CT, 1)
    shift = b_ref[...] - mean * scale                       # (CT, 1)
    # Folded form: output does not depend on xc, so its storage is dead here.
    o_ref[...] = (x * scale + shift).astype(o_ref.dtype)


def _make_stats_kernel(L_total, lt):
    """Large-L fallback pass 1: accumulate sum/sumsq over L tiles, emit
    per-(n, c) scale = (1+gamma)*rsqrt(var+eps) and shift = beta - mean*scale."""
    needs_mask = (L_total % lt) != 0
    inv_n = 1.0 / float(L_total)

    def kernel(x_ref, g_ref, b_ref, scale_ref, shift_ref, sum_sc, sq_sc):
        l = pl.program_id(2)

        @pl.when(l == 0)
        def _():
            sum_sc[...] = jnp.zeros_like(sum_sc)
            sq_sc[...] = jnp.zeros_like(sq_sc)

        xs = x_ref[...].astype(jnp.float32)                  # (CT, LT)
        if needs_mask:  # mask out-of-range lanes of the last partial L tile
            lane = jax.lax.broadcasted_iota(jnp.int32, xs.shape, 1)
            xs = jnp.where(l * lt + lane < L_total, xs, 0.0)

        sum_sc[...] += jnp.sum(xs, axis=1, keepdims=True)
        sq_sc[...] += jnp.sum(xs * xs, axis=1, keepdims=True)

        @pl.when(l == pl.num_programs(2) - 1)
        def _():
            mean = sum_sc[...] * inv_n
            var = jnp.maximum(sq_sc[...] * inv_n - mean * mean, 0.0)
            scale = (1.0 + g_ref[...]) * jax.lax.rsqrt(var + EPS)
            scale_ref[...] = scale
            shift_ref[...] = b_ref[...] - mean * scale

    return kernel


def _apply_kernel(x_ref, scale_ref, shift_ref, o_ref):
    """Large-L fallback pass 2: pure streaming normalize."""
    o_ref[...] = (x_ref[...].astype(jnp.float32) * scale_ref[...]
                  + shift_ref[...]).astype(o_ref.dtype)


# ----------------------------------------------------------------------------
# Tiling / budgeting helpers
# ----------------------------------------------------------------------------
def _vmem_budget():
    """(per-x-block byte budget [f32 elems], vmem_limit_bytes), per generation."""
    try:
        vmem_cap = pltpu.get_tpu_info().vmem_capacity_bytes
    except Exception:
        vmem_cap = 0  # unknown -> conservative
    if vmem_cap > (64 << 20):            # v5e / v6e: 128 MiB physical VMEM
        return 8 << 20, 64 << 20
    # v7x (64 MiB per TC) or unknown: keep total well under ~40 MiB.
    return 4 << 20, 40 << 20


def _pick_c_tile(C, L, sub, max_block_bytes):
    """Largest ct dividing C with ct % sub == 0 (or ct == C) whose (ct, L)
    block fits max_block_bytes (counted at 4 B/elem for the f32 working copy).
    Returns None if even the smallest legal tile does not fit."""
    legal = [d for d in range(1, C + 1)
             if C % d == 0 and (d % sub == 0 or d == C)]
    fitting = [d for d in legal if d * L * 4 <= max_block_bytes]
    return max(fitting) if fitting else None


def _smallest_legal_ct(C, sub):
    return min(d for d in range(1, C + 1)
               if C % d == 0 and (d % sub == 0 or d == C))


# ----------------------------------------------------------------------------
# Forward wrapper
# ----------------------------------------------------------------------------
def adain_forward(x, s, w, b, *, max_block_bytes=None):
    """x: (N, C, L), s: (N, S), w: (S, 2C) pre-transposed, b: (2C,)."""
    N, C, L = x.shape
    out_dtype = x.dtype
    itemsize = jnp.dtype(out_dtype).itemsize
    sub = max(8, 32 // max(itemsize, 1))        # 8 (f32) / 16 (bf16) sublane tile

    block_budget, vmem_limit = _vmem_budget()
    if max_block_bytes is not None:
        block_budget = max_block_bytes

    # Style FC hoisted out of the kernel: one XLA matmul for all N instances.
    h = s.astype(jnp.float32) @ w.astype(jnp.float32) + b.astype(jnp.float32)
    gamma = h[:, :C].reshape(N, C, 1)
    beta = h[:, C:].reshape(N, C, 1)

    ct = _pick_c_tile(C, L, sub, block_budget)
    if ct is not None:
        # -------- Single-pass path: full-L blocks, channel-tiled grid. --------
        return pl.pallas_call(
            _adain_kernel,
            out_shape=jax.ShapeDtypeStruct((N, C, L), out_dtype),
            grid_spec=pltpu.PrefetchScalarGridSpec(
                num_scalar_prefetch=0,
                grid=(N, C // ct),
                in_specs=[
                    pl.BlockSpec((None, ct, L), lambda n, c: (n, c, 0)),  # x
                    pl.BlockSpec((None, ct, 1), lambda n, c: (n, c, 0)),  # gamma
                    pl.BlockSpec((None, ct, 1), lambda n, c: (n, c, 0)),  # beta
                ],
                out_specs=pl.BlockSpec((None, ct, L), lambda n, c: (n, c, 0)),
            ),
            compiler_params=pltpu.CompilerParams(
                dimension_semantics=("parallel", "parallel"),
                vmem_limit_bytes=vmem_limit,
            ),
        )(x, gamma, beta)

    # -------- Large-L fallback: two-pass (stats over L tiles, then apply). ----
    ct = _smallest_legal_ct(C, sub)
    lt = max(128, (block_budget // (ct * 4)) // 128 * 128)
    lt = min(lt, max(128, pl.cdiv(L, 128) * 128))
    n_l = pl.cdiv(L, lt)

    scale, shift = pl.pallas_call(
        _make_stats_kernel(L, lt),
        out_shape=(jax.ShapeDtypeStruct((N, C, 1), jnp.float32),
                   jax.ShapeDtypeStruct((N, C, 1), jnp.float32)),
        grid_spec=pltpu.PrefetchScalarGridSpec(
            num_scalar_prefetch=0,
            grid=(N, C // ct, n_l),
            in_specs=[
                pl.BlockSpec((None, ct, lt), lambda n, c, l: (n, c, l)),  # x
                pl.BlockSpec((None, ct, 1), lambda n, c, l: (n, c, 0)),   # gamma
                pl.BlockSpec((None, ct, 1), lambda n, c, l: (n, c, 0)),   # beta
            ],
            out_specs=(
                pl.BlockSpec((None, ct, 1), lambda n, c, l: (n, c, 0)),   # scale
                pl.BlockSpec((None, ct, 1), lambda n, c, l: (n, c, 0)),   # shift
            ),
            scratch_shapes=[pltpu.VMEM((ct, 1), jnp.float32),
                            pltpu.VMEM((ct, 1), jnp.float32)],
        ),
        compiler_params=pltpu.CompilerParams(
            dimension_semantics=("parallel", "parallel", "arbitrary"),
            vmem_limit_bytes=vmem_limit,
        ),
    )(x, gamma, beta)

    return pl.pallas_call(
        _apply_kernel,
        out_shape=jax.ShapeDtypeStruct((N, C, L), out_dtype),
        grid_spec=pltpu.PrefetchScalarGridSpec(
            num_scalar_prefetch=0,
            grid=(N, C // ct, n_l),
            in_specs=[
                pl.BlockSpec((None, ct, lt), lambda n, c, l: (n, c, l)),  # x
                pl.BlockSpec((None, ct, 1), lambda n, c, l: (n, c, 0)),   # scale
                pl.BlockSpec((None, ct, 1), lambda n, c, l: (n, c, 0)),   # shift
            ],
            out_specs=pl.BlockSpec((None, ct, lt), lambda n, c, l: (n, c, l)),
        ),
        compiler_params=pltpu.CompilerParams(
            dimension_semantics=("parallel", "parallel", "parallel"),
            vmem_limit_bytes=vmem_limit,
        ),
    )(x, scale, shift)


# ----------------------------------------------------------------------------
# Pure-JAX reference (matches the PyTorch module)
# ----------------------------------------------------------------------------
def adain_reference(x, s, w, b):
    h = s @ w + b                                            # (N, 2C)
    C = x.shape[1]
    gamma = h[:, :C][:, :, None]
    beta = h[:, C:][:, :, None]
    mean = jnp.mean(x, axis=2, keepdims=True)
    var = jnp.mean((x - mean) ** 2, axis=2, keepdims=True)
    x_norm = (x - mean) / jnp.sqrt(var + EPS)
    return (1.0 + gamma) * x_norm + beta


if __name__ == "__main__":
    # Shapes consistent with the module's forward:
    #   x: (batch=2, num_features=4, length=16), s: (batch=2, style_dim=8)
    N, C, L, STYLE = 2, 4, 16, 8

    key = jax.random.PRNGKey(0)
    kx, ks, kw, kb = jax.random.split(key, 4)

    x = jax.random.normal(kx, (N, C, L), dtype=jnp.float32)
    s = jax.random.normal(ks, (N, STYLE), dtype=jnp.float32)

    # nn.Linear(style_dim, 2*num_features) init: U(-1/sqrt(in), 1/sqrt(in));
    # weight stored pre-transposed as (style_dim, 2C).
    bound = 1.0 / (STYLE ** 0.5)
    w = jax.random.uniform(kw, (STYLE, 2 * C), minval=-bound, maxval=bound,
                           dtype=jnp.float32)
    b = jax.random.uniform(kb, (2 * C,), minval=-bound, maxval=bound,
                           dtype=jnp.float32)

    # 1) f32 single-pass path at the module's demo shape.
    out = jax.block_until_ready(adain_forward(x, s, w, b))
    ref = adain_reference(x, s, w, b)
    assert out.shape == (N, C, L) and out.dtype == jnp.float32
    assert jnp.allclose(out, ref, atol=1e-5, rtol=1e-5)

    # 2) bf16 streaming path (halved HBM traffic; stats still f32 in-kernel).
    x_bf = x.astype(jnp.bfloat16)
    out_bf = jax.block_until_ready(adain_forward(x_bf, s, w, b))
    ref_bf = adain_reference(x_bf.astype(jnp.float32), s, w, b)
    assert out_bf.dtype == jnp.bfloat16
    assert jnp.allclose(out_bf.astype(jnp.float32), ref_bf, atol=5e-2, rtol=5e-2)

    # 3) Large-L two-pass fallback, forced via a tiny per-block budget.
    N2, C2, L2 = 2, 8, 384
    k1, k2 = jax.random.split(kx)
    x2 = jax.random.normal(k1, (N2, C2, L2), dtype=jnp.float32)
    s2 = jax.random.normal(k2, (N2, STYLE), dtype=jnp.float32)
    w2 = jax.random.uniform(kw, (STYLE, 2 * C2), minval=-bound, maxval=bound,
                            dtype=jnp.float32)
    b2 = jax.random.uniform(kb, (2 * C2,), minval=-bound, maxval=bound,
                            dtype=jnp.float32)
    out2 = jax.block_until_ready(
        adain_forward(x2, s2, w2, b2, max_block_bytes=8 * 128 * 4))
    ref2 = adain_reference(x2, s2, w2, b2)
    assert jnp.allclose(out2, ref2, atol=1e-4, rtol=1e-4)

    print("KERNEL_OK")
</pallas_src>

<mosaic_0001>
module attributes {stable_mosaic.version = 11 : i64} {
  func.func @_adain_kernel(%arg0: i32, %arg1: i32, %arg2: memref<1x4x16xf32, #tpu.memory_space<vmem>>, %arg3: memref<1x4x1xf32, #tpu.memory_space<vmem>>, %arg4: memref<1x4x1xf32, #tpu.memory_space<vmem>>, %arg5: memref<1x4x16xf32, #tpu.memory_space<vmem>>) attributes {dimension_semantics = [#tpu.dimension_semantics<parallel>, #tpu.dimension_semantics<parallel>], iteration_bounds = array<i64: 2, 1>, scalar_prefetch = 0 : i64, scratch_operands = 0 : i64, tpu.core_type = #tpu.core_type<tc>, window_params = [{transform_indices = @transform_0, window_bounds = array<i64: 1, 4, 16>}, {transform_indices = @transform_1, window_bounds = array<i64: 1, 4, 1>}, {transform_indices = @transform_2, window_bounds = array<i64: 1, 4, 1>}, {transform_indices = @transform_3, window_bounds = array<i64: 1, 4, 16>}]} {
    %c0 = arith.constant 0 : index
    %c0_0 = arith.constant 0 : index
    %c0_1 = arith.constant 0 : index
    %0 = vector.load %arg2[%c0, %c0_0, %c0_1] : memref<1x4x16xf32, #tpu.memory_space<vmem>>, vector<1x4x16xf32>
    %1 = vector.shape_cast %0 : vector<1x4x16xf32> to vector<4x16xf32>
    %cst = arith.constant dense<0.000000e+00> : vector<4xf32>
    %2 = vector.multi_reduction <add>, %1, %cst [1] : vector<4x16xf32> to vector<4xf32>
    %3 = vector.shape_cast %2 : vector<4xf32> to vector<4x1xf32>
    %cst_2 = arith.constant 1.600000e+01 : f32
    %4 = vector.broadcast %cst_2 : f32 to vector<4x1xf32>
    %5 = arith.divf %3, %4 : vector<4x1xf32>
    %6 = vector.broadcast %5 : vector<4x1xf32> to vector<4x16xf32>
    %7 = arith.subf %1, %6 : vector<4x16xf32>
    %8 = arith.mulf %7, %7 : vector<4x16xf32>
    %cst_3 = arith.constant dense<0.000000e+00> : vector<4xf32>
    %9 = vector.multi_reduction <add>, %8, %cst_3 [1] : vector<4x16xf32> to vector<4xf32>
    %10 = vector.shape_cast %9 : vector<4xf32> to vector<4x1xf32>
    %cst_4 = arith.constant 1.600000e+01 : f32
    %11 = vector.broadcast %cst_4 : f32 to vector<4x1xf32>
    %12 = arith.divf %10, %11 : vector<4x1xf32>
    %c0_5 = arith.constant 0 : index
    %c0_6 = arith.constant 0 : index
    %c0_7 = arith.constant 0 : index
    %13 = vector.load %arg3[%c0_5, %c0_6, %c0_7] : memref<1x4x1xf32, #tpu.memory_space<vmem>>, vector<1x4x1xf32>
    %14 = vector.shape_cast %13 : vector<1x4x1xf32> to vector<4x1xf32>
    %cst_8 = arith.constant 1.000000e+00 : f32
    %15 = vector.broadcast %cst_8 : f32 to vector<4x1xf32>
    %16 = arith.addf %15, %14 : vector<4x1xf32>
    %cst_9 = arith.constant 9.99999974E-6 : f32
    %17 = vector.broadcast %cst_9 : f32 to vector<4x1xf32>
    %18 = arith.addf %12, %17 : vector<4x1xf32>
    %19 = math.rsqrt %18 : vector<4x1xf32>
    %20 = arith.mulf %16, %19 : vector<4x1xf32>
    %c0_10 = arith.constant 0 : index
    %c0_11 = arith.constant 0 : index
    %c0_12 = arith.constant 0 : index
    %21 = vector.load %arg4[%c0_10, %c0_11, %c0_12] : memref<1x4x1xf32, #tpu.memory_space<vmem>>, vector<1x4x1xf32>
    %22 = vector.shape_cast %21 : vector<1x4x1xf32> to vector<4x1xf32>
    %23 = arith.mulf %5, %20 : vector<4x1xf32>
    %24 = arith.subf %22, %23 : vector<4x1xf32>
    %25 = vector.broadcast %20 : vector<4x1xf32> to vector<4x16xf32>
    %26 = arith.mulf %1, %25 : vector<4x16xf32>
    %27 = vector.broadcast %24 : vector<4x1xf32> to vector<4x16xf32>
    %28 = arith.addf %26, %27 : vector<4x16xf32>
    %c0_13 = arith.constant 0 : index
    %c0_14 = arith.constant 0 : index
    %c0_15 = arith.constant 0 : index
    %29 = vector.load %arg5[%c0_13, %c0_14, %c0_15] : memref<1x4x16xf32, #tpu.memory_space<vmem>>, vector<1x4x16xf32>
    %30 = vector.shape_cast %29 : vector<1x4x16xf32> to vector<4x16xf32>
    %31 = vector.shape_cast %28 : vector<4x16xf32> to vector<1x4x16xf32>
    tpu.vector_store %arg5[%c0_13, %c0_14, %c0_15], %31 {strides = array<i32>} : memref<1x4x16xf32, #tpu.memory_space<vmem>>, vector<1x4x16xf32>,
    return
  }
  func.func @transform_0(%arg0: i32, %arg1: i32) -> (i32, i32, i32) {
    %c0_i32 = arith.constant 0 : i32
    %c0_i32_0 = arith.constant 0 : i32
    return %arg0, %arg1, %c0_i32 : i32, i32, i32
  }
  func.func @transform_1(%arg0: i32, %arg1: i32) -> (i32, i32, i32) {
    %c0_i32 = arith.constant 0 : i32
    %c0_i32_0 = arith.constant 0 : i32
    return %arg0, %arg1, %c0_i32 : i32, i32, i32
  }
  func.func @transform_2(%arg0: i32, %arg1: i32) -> (i32, i32, i32) {
    %c0_i32 = arith.constant 0 : i32
    %c0_i32_0 = arith.constant 0 : i32
    return %arg0, %arg1, %c0_i32 : i32, i32, i32
  }
  func.func @transform_3(%arg0: i32, %arg1: i32) -> (i32, i32, i32) {
    %c0_i32 = arith.constant 0 : i32
    %c0_i32_0 = arith.constant 0 : i32
    return %arg0, %arg1, %c0_i32 : i32, i32, i32
  }
}

</mosaic_0001>

<bundles_post_ra>
// kernel: tpu_custom_call.1
= control target key start
LH: loop header
LB: loop body
LE: loop exit
PB: predicated region body
PF: predicated region fallthrough
CT: control target
= control target key end

     0   :  { %8 = vsyncpa [#allocation3], 0  ;;  %s703_s0 = inlined_call_operand.vmem [shape: f32[2,4,16], index: 0, kind: input, shape index: {}]   ;;  %s704_s1 = inlined_call_operand.vmem [shape: f32[2,4,1], index: 1, kind: input, shape index: {}]   ;;  %s705_s2 = inlined_call_operand.vmem [shape: f32[2,4,1], index: 2, kind: input, shape index: {}]   ;;  %s706_s3 = inlined_call_operand.hbm [shape: f32[2,4,16], index: 3, kind: output, shape index: {}]  }
   0x1   :  { %10 = vsyncpa [#allocation3 + $0x1], 0  ;;  %s592_s12 = smov 0   ;;  %s594_s13 = smov 0  }
   0x2   :  { %s596_s14 = smov 0   ;;  %s598_s15 = smov 0  }
   0x3   :  { %s600_s16 = smov 0   ;;  %s602_s17 = smov 0  }
   0x4 LB: > { %s414_s18 = sadd.s32 4294967295, %s568_s17   ;;  %s415_s19 = sadd.s32 4294967294, %s568_s17   ;;  %s568_s17 = sphi %s602_s17, %s16_s17   ;;  %s564_s16 = sphi %s600_s16, %s713_s16   ;;  %s560_s15 = sphi %s598_s15, %s712_s15   ;;  %s556_s14 = sphi %s596_s14, %s711_s14   ;;  %s552_s13 = sphi %s594_s13, %s710_s13   ;;  %s548_s12 = sphi %s592_s12, %s709_s12  }
   0x5   : > { %s28_s20 = sadd.s32 1, %s564_s16  ;;  %s121_s21 = sadd.s32 1, %s556_s14 }
   0x6   : > { %p30_p0 = scmp.ge.s32.totalorder %s28_s20, 2  ;;  %p131_p1 = scmp.ne.s32.totalorder %s556_s14, %s552_s13 }
   0x7   : > { %p132_p2 = scmp.eq.s32.totalorder %s414_s18, 1  ;;  %p137_p3 = scmp.ne.s32.totalorder %s552_s13, %s548_s12 }
   0x8   : > { %s715_s20 = smov (%p30_p0, %s28_s20), 0  ;;  %p138_p5 = scmp.eq.s32.totalorder %s415_s19, 1 }
   0x9   : > { %p632_p4 = por %p132_p2, %p131_p1  ;;  %s116_s23 = ssub.s32 %s564_s16, %s715_s20 }
   0xa   : > { %p418_p6 = scmp.ge.s32.totalorder %s568_s17, 1  ;;  %p119_p7 = scmp.eq.s32.totalorder %s116_s23, 0 }
   0xb   : > { %p639_p8 = por %p138_p5, %p137_p3  ;;  %p186_p9 = scmp.lt.s32.totalorder %s568_s17, 3 }
   0xc   : > { %s645_s25 = scalar_select %p119_p7, %s556_s14, %s121_s21  }
   0xd   : > { %p187_p10 = pnand %p418_p6, %p186_p9 }
   0xe   : > { %p226_p11 = scmp.lt.s32.totalorder (!%p187_p10), %s560_s15, 1  ;;  %s223_s10 = sand.u32 (!%p187_p10), 1, %s552_s13  }
   0xf   : > { %190 = sbr.rel (%p187_p10) target bundleno = 417 (0x1a1), region = 32  ;;  %s419_s11 = sshll.u32 (!%p187_p10), %s223_s10, 2 }
  0x10   : > { %s424_s18 = sshll.u32 (!%p187_p10), %s560_s15, 2 }
  0x11   : > { %s308_s23 = scalar_lea.hbm (!%p187_p10), %s706_s3, %s424_s18 }
  0x12   : > { %s312_s29 = sshll.u32 (!%p187_p10), %s308_s23, 4  ;;  %s313_s29 = int_to_ptr.hbm [resolvable:$true] %s312_s29 }
  0x14   : > { %s227_s26 = scalar_select %p226_p11, %s560_s15, 1  ;;  %vm248_vm0 = vcmask 125952   ;;  %v570_v2 = vmov 16.0   ;;  %v571_v14 = vmov 0  }
  0x15   : > { %486 = vrcp.f32 %v570_v2  ;;  %484 = vset.pattern.permute.xlu1 %v571_v14  ;;  %485 = vset.pattern.permute.xlu0 %v571_v14 }
  0x16   : > { %s649_s27 = sshll.u32 %s227_s26, 2  ;;  %s225_s26 = scalar_lea.vmem [#allocation2], %s419_s11 }
  0x17   : > { %s232_s30 = scalar_lea.vmem %s703_s0, %s649_s27  ;;  %s239_s6 = scalar_lea.vmem %s704_s1, %s649_s27 }
  0x18   : > { %v247_v0 = vld [vmem:[%s232_s30] sm:$0xf]  ;;  %s246_s9 = scalar_lea.vmem %s705_s2, %s649_s27  ;;  %s310_s28 = sshll.u32 %s225_s26, 4  ;;  %s311_s28 = int_to_ptr.vmem [resolvable:$true] %s310_s28 }
  0x19   : > { %v249_v1 = vsel %vm248_vm0, %v247_v0, 0.0  ;;  %v266_v22 = vld [vmem:[%s239_s6] sm:$0xf]  ;;  %s297_s27 = scalar_lea.sflag [#allocation3], %s223_s10  ;;  %s504_s30 = sshra.s32 %s313_s29, 4  ;;  %s505_s30 = int_to_ptr.hbm [resolvable:$true] %s504_s30 }
  0x1a   : > { %250 = vadd.xlane.f32.xlu0 %v249_v1  ;;  %v267_v24 = vadd.f32 1.0, %v266_v22  ;;  %v280_v29 = vld [vmem:[%s246_s9] sm:$0xf]  ;;  %s506_s4 = scalar_lea.hbm %s505_s30, 4  ;;  %s510_s6 = scalar_lea.hbm %s706_s3, 8 }
  0x1b   : > { %v487_v3 = vpop.eup %486  ;;  %p507_p12 = scmp.ne.s32.totalorder %s505_s30, %s506_s4  ;;  %p511_p1 = scmp.lt.s32.totalorder %s505_s30, %s706_s3 }
  0x1c   : > { %v253_v4 = vmul.f32 16.0, %v487_v3  ;;  %vm257_vm1 = vweird.f32 %v487_v3  ;;  %p512_p2 = scmp.lt.s32.totalorder %s510_s6, %s506_s4 }
  0x1d   : > { %p508_p13 = pnand %p507_p12, %p632_p4 }
  0x1e   : > { %v254_v5 = vsub.f32 1.0, %v253_v4  ;;  %p513_p3 = por %p512_p2, %p511_p1 }
  0x1f   : > { %p509_p0 = pneg %p508_p13 }
  0x20   : > { %v255_v6 = vmul.f32 %v487_v3, %v254_v5 }
  0x21   : > { %p514_p5 = pnand %p513_p3, %p509_p0 }
  0x22   : > { %v256_v7 = vadd.f32 %v487_v3, %v255_v6 }
  0x24   : > { %v258_v8 = vsel %vm257_vm1, %v487_v3, %v256_v7 }
  0x8d   : > { %v251_v9 = vpop.xlane.xlu0 %250 }
  0x8e   : > { %v259_v10 = vmul.f32 %v258_v8, %v251_v9 }
  0x90   : > { %v260_v11 = vsub.f32 %v247_v0, %v259_v10 }
  0x92   : > { %v261_v12 = vmul.f32 %v260_v11, %v260_v11 }
  0x94   : > { %v262_v13 = vsel %vm248_vm0, %v261_v12, 0.0 }
  0x95   : > { %263 = vadd.xlane.f32.xlu0 %v262_v13 }
 0x108   : > { %v264_v15 = vpop.xlane.xlu0 %263 }
 0x109   : > { %v265_v16 = vmul.f32 %v264_v15, %v258_v8 }
 0x10b   : > { %v268_v17 = vadd.f32 1e-05, %v265_v16 }
 0x10d   : > { %488 = vrsqrt.f32 %v268_v17  ;;  %vm275_vm3 = vweird.f32 %v268_v17 }
 0x113   : > { %v489_v18 = vpop.eup %488 }
 0x114   : > { %v270_v19 = vmul.f32 %v489_v18, %v268_v17  ;;  %vm276_vm2 = vweird.f32 %v489_v18 }
 0x115   : > { %vm277_vm4 = vmor %vm275_vm3, %vm276_vm2 }
 0x116   : > { %v271_v20 = vmul.f32 %v489_v18, %v270_v19 }
 0x118   : > { %v272_v21 = vmul.f32 0.5, %v271_v20 }
 0x11a   : > { %v273_v23 = vsub.f32 1.5, %v272_v21 }
 0x11c   : > { %v274_v25 = vmul.f32 %v489_v18, %v273_v23 }
 0x11e   : > { %v278_v26 = vsel %vm277_vm4, %v489_v18, %v274_v25 }
 0x11f   : > { %v279_v27 = vmul.f32 %v278_v26, %v267_v24 }
 0x121   : > { %285 = vperm.xlu1 %484, %v279_v27   ;;  %v281_v28 = vmul.f32 %v279_v27, %v259_v10 }
 0x123   : > { %v282_v30 = vsub.f32 %v280_v29, %v281_v28 }
 0x129   : > { %291 = vperm.xlu1 %484, %v282_v30  }
 0x193   : > { %v286_v31 = vpop.permute.xlu1 %285 }
 0x194   : > { %v288_v32 = vmul.f32 %v286_v31, %v247_v0 }
 0x19b   : > { %v292_v33 = vpop.permute.xlu1 %291 }
 0x19c   : > { %v294_v34 = vadd.f32 %v292_v33, %v288_v32 }
 0x19e   : > { %295 = vst.msk [vmem:[%s225_s26] sm:$0xf] %vm248_vm0, %v294_v34 }
 0x19f   : > { %517 = shalt.err (!%p514_p5)
}
 0x1a0   : > { %427 = dma.vmem_to_hbm [thread:$0]  (%p632_p4), %s311_s28, 64, %s313_s29, %s297_s27  }
 0x1a1 PF: > { %p433_p6 = scmp.ge.s32.totalorder %s568_s17, 2  ;;  %s324_s9 = sand.u32 1, %s548_s12  }
 0x1a2   : > { %s325_s10 = scalar_lea.sflag [#allocation3], %s324_s9 }
 0x1a3   : > { %p430_p7 = pnand %p433_p6, %p639_p8 }
 0x1a5   : > { %p431_p9 = pneg %p430_p7 }
 0x1a7   : > { %543 = dma.done.wait (%p431_p9), %s325_s10, 64  }
 0x1a8   : > { %545 = vsyncadd (%p431_p9), %s325_s10, 4294967232  ;;  %s16_s17 = sadd.s32 1, %s568_s17   ;;  %s709_s12 = smov %s552_s13 }
 0x1a9   : > { %p13_p10 = scmp.ge.s32.totalorder %s16_s17, 4   ;;  %s710_s13 = smov %s556_s14 }
 0x1aa   : > { %s711_s14 = smov %s645_s25  ;;  %s712_s15 = smov %s564_s16 }
 0x1ab   : > { %s713_s16 = smov %s715_s20  ;;  %15 = sbr.rel (!%p13_p10) target bundleno = 4 (0x4), region = 73 }
 0x1b0   :  { %331 = vsyncpa [#allocation3], 1 }
 0x1b1   :  { %333 = vsyncpa [#allocation3 + $0x1], 1 }

</bundles_post_ra>
